<compile_context>
chip_gen: v5e
topology: v5e:2x2
jax: 0.10.0
libtpu: 0.0.40
codegen_flags: <defaults>
</compile_context>

<pallas_src>
import functools

import jax
import jax.numpy as jnp
from jax import lax
from jax.experimental import pallas as pl
from jax.experimental.pallas import tpu as pltpu
import numpy as np


def ocn_selfatt_kernel(u_ref, umask_ref, v_ref, vmask_ref,
                       w1_ref, w2_ref, b12_ref, w3_ref,
                       wfA_ref, wfB_ref, wfC_ref, bf_ref, o_ref,
                       *, mxu_dtype):
    u = u_ref[...]            # (Bt, L, Hp)  f32   == OPK tile
    v = v_ref[...]            # (Bt, L, Hp)  f32   == _OPK tile
    umask = umask_ref[...]    # (Bt, L, 1)
    vmask = vmask_ref[...]    # (Bt, 1, L)
    Bt, L, Hp = u.shape

    ub = u.astype(mxu_dtype)
    vb = v.astype(mxu_dtype)

    # part1 = W1(u) + (b1 + b2): VPU multiply + cross-lane (XLU) reduction,
    # result already in (Bt, L, 1) orientation. No degenerate width-1 matmul.
    part1 = jnp.sum(u * w1_ref[...], axis=-1, keepdims=True) + b12_ref[...]

    # part2 = W2(v)^T: tiny batched matmul so the result comes out directly in
    # (Bt, 1, Lv) lane orientation (no sublane->lane relayout needed).
    w2b = jnp.broadcast_to(w2_ref[...].reshape(1, 1, Hp), (Bt, 1, Hp))
    part2 = lax.dot_general(w2b, v,
                            dimension_numbers=(((2,), (2,)), ((0,), (0,))),
                            preferred_element_type=jnp.float32)     # (Bt,1,L)

    # part3 = (W3 * u) @ v^T, batched on the MXU (bf16 operands, f32 accum).
    w3u = (w3_ref[...] * u).astype(mxu_dtype)
    part3 = lax.dot_general(w3u, vb,
                            dimension_numbers=(((2,), (2,)), ((0,), (0,))),
                            preferred_element_type=jnp.float32)     # (Bt,L,L)

    umask_add = (1.0 - umask) * -10000.0
    vmask_add = (1.0 - vmask) * -10000.0
    A = part1 + part2 + part3 + umask_add + vmask_add               # (Bt,Lu,Lv)

    # softmax over Lu (dim=1 of (B, Lu, Lv)), f32 on VPU/EUP.
    m = jnp.max(A, axis=1, keepdims=True)
    e = jnp.exp(A - m)
    s = jnp.sum(e, axis=1, keepdims=True)
    att = e * pl.reciprocal(s, approx=False)                        # (Bt,Lu,Lv)

    # OSK = bmm(OPK^T, att)^T  ==  att^T @ OPK  per batch -> (Bt, Lv, Hp)
    osk = lax.dot_general(att.astype(mxu_dtype), ub,
                          dimension_numbers=(((1,), (1,)), ((0,), (0,))),
                          preferred_element_type=jnp.float32)

    # OFK = relu(cat([v, osk, v-osk, v*osk], -1) @ Wf^T + bf), algebraically
    # folded to 3 matmuls (wfA = wf1+wf3, wfB = wf2-wf3, wfC = wf4) and stacked
    # over all Bt*L rows so the MXU sees one tall matmul.
    # (L is a multiple of 8, so the (Bt,L,Hp)->(Bt*L,Hp) collapse is layout-free.)
    v2 = v.reshape(Bt * L, Hp)
    o2 = osk.reshape(Bt * L, Hp)
    pre = (jnp.dot(v2.astype(mxu_dtype), wfA_ref[...],
                   preferred_element_type=jnp.float32)
           + jnp.dot(o2.astype(mxu_dtype), wfB_ref[...],
                     preferred_element_type=jnp.float32)
           + jnp.dot((v2 * o2).astype(mxu_dtype), wfC_ref[...],
                     preferred_element_type=jnp.float32)
           + bf_ref[...])
    o_ref[...] = jnp.maximum(pre, 0.0).reshape(Bt, L, Hp).astype(o_ref.dtype)


def _pick_block_b(B):
    for cand in (16, 8, 4, 2, 1):
        if B % cand == 0:
            return cand
    return 1


def ocn_selfatt(opk, opk_mask, _opk, _opk_mask, params, *,
                block_b=None, mxu_dtype=jnp.bfloat16):
    B, L, H = opk.shape
    w1, b1, w2, b2, w3, wf, bf = params
    f32 = jnp.float32

    Bt = _pick_block_b(B) if block_b is None else block_b
    assert B % Bt == 0, "block_b must divide batch size"

    # Lane-pad the hidden dim to a multiple of 128 so every block is lane-dense.
    Hp = ((H + 127) // 128) * 128
    ph = Hp - H

    def pad_last(x):
        return jnp.pad(x, [(0, 0)] * (x.ndim - 1) + [(0, ph)]) if ph else x

    u = pad_last(opk.astype(f32))
    v = pad_last(_opk.astype(f32))
    umask = opk_mask.astype(f32).reshape(B, L, 1)
    vmask = _opk_mask.astype(f32).reshape(B, 1, L)

    # nn.Linear(H, 1).weight is (1, H); W3 parameter is (1, 1, H).
    w1r = pad_last(w1.reshape(1, H).astype(f32))
    w2r = pad_last(w2.reshape(1, H).astype(f32))
    w3r = pad_last(w3.reshape(1, H).astype(f32))
    b12 = (b1.reshape(()) + b2.reshape(())).reshape(1, 1).astype(f32)

    # nn.Linear(4H, H).weight is (H, 4H); row-blocks of Wf^T correspond to the
    # 4 concatenated inputs [v, osk, v-osk, v*osk].  Fold 4 matmuls -> 3.
    wfT = wf.T.astype(f32)                                   # (4H, H)
    wf1, wf2, wf3, wf4 = jnp.split(wfT, 4, axis=0)

    def pad_sq(mat):
        return jnp.pad(mat, ((0, ph), (0, ph))) if ph else mat

    wfA = pad_sq(wf1 + wf3).astype(mxu_dtype)
    wfB = pad_sq(wf2 - wf3).astype(mxu_dtype)
    wfC = pad_sq(wf4).astype(mxu_dtype)
    bfr = pad_last(bf.reshape(1, H).astype(f32))

    kernel = functools.partial(ocn_selfatt_kernel, mxu_dtype=mxu_dtype)

    out = pl.pallas_call(
        kernel,
        out_shape=jax.ShapeDtypeStruct((B, L, Hp), opk.dtype),
        grid_spec=pltpu.PrefetchScalarGridSpec(
            num_scalar_prefetch=0,
            grid=(B // Bt,),
            in_specs=[
                pl.BlockSpec((Bt, L, Hp), lambda b: (b, 0, 0)),   # OPK
                pl.BlockSpec((Bt, L, 1), lambda b: (b, 0, 0)),    # OPK_mask
                pl.BlockSpec((Bt, L, Hp), lambda b: (b, 0, 0)),   # _OPK
                pl.BlockSpec((Bt, 1, L), lambda b: (b, 0, 0)),    # _OPK_mask
                pl.BlockSpec((1, Hp), lambda b: (0, 0)),          # W1 weight
                pl.BlockSpec((1, Hp), lambda b: (0, 0)),          # W2 weight
                pl.BlockSpec((1, 1), lambda b: (0, 0)),           # b1 + b2
                pl.BlockSpec((1, Hp), lambda b: (0, 0)),          # W3
                pl.BlockSpec((Hp, Hp), lambda b: (0, 0)),         # wf1 + wf3
                pl.BlockSpec((Hp, Hp), lambda b: (0, 0)),         # wf2 - wf3
                pl.BlockSpec((Hp, Hp), lambda b: (0, 0)),         # wf4
                pl.BlockSpec((1, Hp), lambda b: (0, 0)),          # Wf bias
            ],
            out_specs=pl.BlockSpec((Bt, L, Hp), lambda b: (b, 0, 0)),
        ),
        compiler_params=pltpu.CompilerParams(
            dimension_semantics=("parallel",),
            vmem_limit_bytes=48 * 1024 * 1024,
        ),
    )(u, umask, v, vmask, w1r, w2r, b12, w3r, wfA, wfB, wfC, bfr)

    return out[:, :, :H] if ph else out


def ocn_selfatt_ref(opk, opk_mask, _opk, _opk_mask, params):
    """Pure-JAX reference mirroring the PyTorch forward exactly."""
    w1, b1, w2, b2, w3, wf, bf = params
    part1 = opk @ w1.T + b1                                   # (B, Lu, 1)
    part2 = jnp.transpose(_opk @ w2.T + b2, (0, 2, 1))        # (B, 1, Lv)
    part3 = jnp.einsum('blh,bmh->blm', w3.reshape(1, 1, -1) * opk, _opk)
    um = (1.0 - opk_mask.astype(jnp.float32)) * -10000.0
    vm = (1.0 - _opk_mask.astype(jnp.float32)) * -10000.0
    A = part1 + part2 + part3 + um[:, :, None] + vm[:, None, :]
    att = jax.nn.softmax(A, axis=1)
    osk = jnp.einsum('blm,blh->bmh', att, opk)                # (B, Lv, H)
    ofk = jnp.concatenate([_opk, osk, _opk - osk, _opk * osk], axis=2)
    return jax.nn.relu(ofk @ wf.T + bf)


if __name__ == "__main__":
    B, L, H = 2, 8, 32

    key = jax.random.PRNGKey(0)
    keys = jax.random.split(key, 10)

    w1 = jax.random.uniform(keys[0], (1, H), jnp.float32, -0.2, 0.2)
    b1 = jax.random.uniform(keys[1], (1,), jnp.float32, -0.2, 0.2)
    w2 = jax.random.uniform(keys[2], (1, H), jnp.float32, -0.2, 0.2)
    b2 = jax.random.uniform(keys[3], (1,), jnp.float32, -0.2, 0.2)
    w3 = jax.random.uniform(keys[4], (1, 1, H), jnp.float32, -0.2, 0.2)
    wf = jax.random.uniform(keys[5], (H, 4 * H), jnp.float32, -0.1, 0.1)
    bf = jax.random.uniform(keys[6], (H,), jnp.float32, -0.1, 0.1)
    params = (w1, b1, w2, b2, w3, wf, bf)

    opk = jax.random.normal(keys[7], (B, L, H), jnp.float32)
    _opk = opk  # self-attention: same sequence on both sides
    # valid-token masks (1 = keep), last two positions of batch 1 padded out
    opk_mask = jnp.ones((B, L), jnp.int32).at[1, -2:].set(0)
    _opk_mask = opk_mask

    ref = ocn_selfatt_ref(opk, opk_mask, _opk, _opk_mask, params)

    # Exact path: f32 MXU operands, strict tolerance.
    out_f32 = ocn_selfatt(opk, opk_mask, _opk, _opk_mask, params,
                          mxu_dtype=jnp.float32)
    out_f32 = jax.block_until_ready(out_f32)
    np.testing.assert_allclose(np.asarray(out_f32), np.asarray(ref),
                               rtol=1e-4, atol=1e-4)

    # Fast path (default): bf16 MXU operands with f32 accumulation.
    out_bf16 = ocn_selfatt(opk, opk_mask, _opk, _opk_mask, params,
                           mxu_dtype=jnp.bfloat16)
    out_bf16 = jax.block_until_ready(out_bf16)
    np.testing.assert_allclose(np.asarray(out_bf16), np.asarray(ref),
                               rtol=2e-2, atol=2e-2)

    print("KERNEL_OK")
</pallas_src>

<mosaic_0001>
module attributes {stable_mosaic.version = 11 : i64} {
  func.func @ocn_selfatt_kernel(%arg0: i32, %arg1: memref<2x8x128xf32, #tpu.memory_space<vmem>>, %arg2: memref<2x8x1xf32, #tpu.memory_space<vmem>>, %arg3: memref<2x8x128xf32, #tpu.memory_space<vmem>>, %arg4: memref<2x1x8xf32, #tpu.memory_space<vmem>>, %arg5: memref<1x128xf32, #tpu.memory_space<vmem>>, %arg6: memref<1x128xf32, #tpu.memory_space<vmem>>, %arg7: memref<1x1xf32, #tpu.memory_space<vmem>>, %arg8: memref<1x128xf32, #tpu.memory_space<vmem>>, %arg9: memref<128x128xf32, #tpu.memory_space<vmem>>, %arg10: memref<128x128xf32, #tpu.memory_space<vmem>>, %arg11: memref<128x128xf32, #tpu.memory_space<vmem>>, %arg12: memref<1x128xf32, #tpu.memory_space<vmem>>, %arg13: memref<2x8x128xf32, #tpu.memory_space<vmem>>) attributes {dimension_semantics = [#tpu.dimension_semantics<parallel>], iteration_bounds = array<i64: 1>, scalar_prefetch = 0 : i64, scratch_operands = 0 : i64, tpu.core_type = #tpu.core_type<tc>, window_params = [{transform_indices = @transform_0, window_bounds = array<i64: 2, 8, 128>}, {transform_indices = @transform_1, window_bounds = array<i64: 2, 8, 1>}, {transform_indices = @transform_2, window_bounds = array<i64: 2, 8, 128>}, {transform_indices = @transform_3, window_bounds = array<i64: 2, 1, 8>}, {pipeline_mode = #tpu.pipeline_mode<synchronous>, transform_indices = @transform_4, window_bounds = array<i64: 1, 128>}, {pipeline_mode = #tpu.pipeline_mode<synchronous>, transform_indices = @transform_5, window_bounds = array<i64: 1, 128>}, {pipeline_mode = #tpu.pipeline_mode<synchronous>, transform_indices = @transform_6, window_bounds = array<i64: 1, 1>}, {pipeline_mode = #tpu.pipeline_mode<synchronous>, transform_indices = @transform_7, window_bounds = array<i64: 1, 128>}, {pipeline_mode = #tpu.pipeline_mode<synchronous>, transform_indices = @transform_8, window_bounds = array<i64: 128, 128>}, {pipeline_mode = #tpu.pipeline_mode<synchronous>, transform_indices = @transform_9, window_bounds = array<i64: 128, 128>}, {pipeline_mode = #tpu.pipeline_mode<synchronous>, transform_indices = @transform_10, window_bounds = array<i64: 128, 128>}, {pipeline_mode = #tpu.pipeline_mode<synchronous>, transform_indices = @transform_11, window_bounds = array<i64: 1, 128>}, {transform_indices = @transform_12, window_bounds = array<i64: 2, 8, 128>}]} {
    %c0 = arith.constant 0 : index
    %c0_0 = arith.constant 0 : index
    %c0_1 = arith.constant 0 : index
    %0 = vector.load %arg1[%c0, %c0_0, %c0_1] : memref<2x8x128xf32, #tpu.memory_space<vmem>>, vector<2x8x128xf32>
    %c0_2 = arith.constant 0 : index
    %c0_3 = arith.constant 0 : index
    %c0_4 = arith.constant 0 : index
    %1 = vector.load %arg3[%c0_2, %c0_3, %c0_4] : memref<2x8x128xf32, #tpu.memory_space<vmem>>, vector<2x8x128xf32>
    %c0_5 = arith.constant 0 : index
    %c0_6 = arith.constant 0 : index
    %c0_7 = arith.constant 0 : index
    %2 = vector.load %arg2[%c0_5, %c0_6, %c0_7] : memref<2x8x1xf32, #tpu.memory_space<vmem>>, vector<2x8x1xf32>
    %c0_8 = arith.constant 0 : index
    %c0_9 = arith.constant 0 : index
    %c0_10 = arith.constant 0 : index
    %3 = vector.load %arg4[%c0_8, %c0_9, %c0_10] : memref<2x1x8xf32, #tpu.memory_space<vmem>>, vector<2x1x8xf32>
    %c0_11 = arith.constant 0 : index
    %c0_12 = arith.constant 0 : index
    %4 = vector.load %arg5[%c0_11, %c0_12] : memref<1x128xf32, #tpu.memory_space<vmem>>, vector<1x128xf32>
    %5 = vector.shape_cast %4 : vector<1x128xf32> to vector<1x1x128xf32>
    %6 = vector.broadcast %5 : vector<1x1x128xf32> to vector<2x8x128xf32>
    %7 = arith.mulf %0, %6 : vector<2x8x128xf32>
    %cst = arith.constant dense<0.000000e+00> : vector<2x8xf32>
    %8 = vector.multi_reduction <add>, %7, %cst [2] : vector<2x8x128xf32> to vector<2x8xf32>
    %9 = vector.shape_cast %8 : vector<2x8xf32> to vector<2x8x1xf32>
    %c0_13 = arith.constant 0 : index
    %c0_14 = arith.constant 0 : index
    %10 = vector.load %arg7[%c0_13, %c0_14] : memref<1x1xf32, #tpu.memory_space<vmem>>, vector<1x1xf32>
    %11 = vector.shape_cast %10 : vector<1x1xf32> to vector<1x1x1xf32>
    %12 = vector.broadcast %11 : vector<1x1x1xf32> to vector<2x8x1xf32>
    %13 = arith.addf %9, %12 : vector<2x8x1xf32>
    %c0_15 = arith.constant 0 : index
    %c0_16 = arith.constant 0 : index
    %14 = vector.load %arg6[%c0_15, %c0_16] : memref<1x128xf32, #tpu.memory_space<vmem>>, vector<1x128xf32>
    %15 = vector.shape_cast %14 : vector<1x128xf32> to vector<1x1x128xf32>
    %16 = vector.shape_cast %15 : vector<1x1x128xf32> to vector<1x1x128xf32>
    %17 = vector.broadcast %16 : vector<1x1x128xf32> to vector<2x1x128xf32>
    %cst_17 = arith.constant dense<0.000000e+00> : vector<2x1x8xf32>
    %18 = tpu.matmul %17, %1, %cst_17 {dimension_numbers = #tpu.dot_dimension_numbers<[2], [2], [1], [1], [0, 0, 0, 1, 1, 1], [0], [0]>} : vector<2x1x128xf32>, vector<2x8x128xf32>, vector<2x1x8xf32> -> vector<2x1x8xf32>
    %c0_18 = arith.constant 0 : index
    %c0_19 = arith.constant 0 : index
    %19 = vector.load %arg8[%c0_18, %c0_19] : memref<1x128xf32, #tpu.memory_space<vmem>>, vector<1x128xf32>
    %20 = vector.shape_cast %19 : vector<1x128xf32> to vector<1x1x128xf32>
    %21 = vector.broadcast %20 : vector<1x1x128xf32> to vector<2x8x128xf32>
    %22 = arith.mulf %21, %0 : vector<2x8x128xf32>
    %cst_20 = arith.constant dense<0.000000e+00> : vector<2x8x8xf32>
    %23 = tpu.matmul %22, %1, %cst_20 {dimension_numbers = #tpu.dot_dimension_numbers<[2], [2], [1], [1], [0, 0, 0, 1, 1, 1], [0], [0]>} : vector<2x8x128xf32>, vector<2x8x128xf32>, vector<2x8x8xf32> -> vector<2x8x8xf32>
    %cst_21 = arith.constant 1.000000e+00 : f32
    %24 = vector.broadcast %cst_21 : f32 to vector<2x8x1xf32>
    %25 = arith.subf %24, %2 : vector<2x8x1xf32>
    %cst_22 = arith.constant -1.000000e+04 : f32
    %26 = vector.broadcast %cst_22 : f32 to vector<2x8x1xf32>
    %27 = arith.mulf %25, %26 : vector<2x8x1xf32>
    %cst_23 = arith.constant 1.000000e+00 : f32
    %28 = vector.broadcast %cst_23 : f32 to vector<2x1x8xf32>
    %29 = arith.subf %28, %3 : vector<2x1x8xf32>
    %cst_24 = arith.constant -1.000000e+04 : f32
    %30 = vector.broadcast %cst_24 : f32 to vector<2x1x8xf32>
    %31 = arith.mulf %29, %30 : vector<2x1x8xf32>
    %32 = vector.broadcast %13 : vector<2x8x1xf32> to vector<2x8x8xf32>
    %33 = vector.broadcast %18 : vector<2x1x8xf32> to vector<2x8x8xf32>
    %34 = arith.addf %32, %33 : vector<2x8x8xf32>
    %35 = arith.addf %34, %23 : vector<2x8x8xf32>
    %36 = vector.broadcast %27 : vector<2x8x1xf32> to vector<2x8x8xf32>
    %37 = arith.addf %35, %36 : vector<2x8x8xf32>
    %38 = vector.broadcast %31 : vector<2x1x8xf32> to vector<2x8x8xf32>
    %39 = arith.addf %37, %38 : vector<2x8x8xf32>
    %cst_25 = arith.constant dense<0xFF800000> : vector<2x8xf32>
    %40 = vector.multi_reduction <maximumf>, %39, %cst_25 [1] : vector<2x8x8xf32> to vector<2x8xf32>
    %41 = vector.shape_cast %40 : vector<2x8xf32> to vector<2x1x8xf32>
    %42 = vector.broadcast %41 : vector<2x1x8xf32> to vector<2x8x8xf32>
    %43 = arith.subf %39, %42 : vector<2x8x8xf32>
    %44 = math.exp %43 : vector<2x8x8xf32>
    %cst_26 = arith.constant dense<0.000000e+00> : vector<2x8xf32>
    %45 = vector.multi_reduction <add>, %44, %cst_26 [1] : vector<2x8x8xf32> to vector<2x8xf32>
    %46 = vector.shape_cast %45 : vector<2x8xf32> to vector<2x1x8xf32>
    %47 = tpu.reciprocal %46 : vector<2x1x8xf32> -> vector<2x1x8xf32>
    %48 = vector.broadcast %47 : vector<2x1x8xf32> to vector<2x8x8xf32>
    %49 = arith.mulf %44, %48 : vector<2x8x8xf32>
    %cst_27 = arith.constant dense<0.000000e+00> : vector<2x8x128xf32>
    %50 = tpu.matmul %49, %0, %cst_27 {dimension_numbers = #tpu.dot_dimension_numbers<[1], [1], [2], [2], [0, 0, 0, 2, 1, 2], [0], [0]>} : vector<2x8x8xf32>, vector<2x8x128xf32>, vector<2x8x128xf32> -> vector<2x8x128xf32>
    %51 = vector.shape_cast %1 : vector<2x8x128xf32> to vector<16x128xf32>
    %52 = vector.shape_cast %50 : vector<2x8x128xf32> to vector<16x128xf32>
    %c0_28 = arith.constant 0 : index
    %c0_29 = arith.constant 0 : index
    %53 = vector.load %arg9[%c0_28, %c0_29] : memref<128x128xf32, #tpu.memory_space<vmem>>, vector<128x128xf32>
    %cst_30 = arith.constant dense<0.000000e+00> : vector<16x128xf32>
    %54 = tpu.matmul %51, %53, %cst_30 {dimension_numbers = #tpu.dot_dimension_numbers<[1], [0], [0], [1], [0, 0, 1, 1], [], []>} : vector<16x128xf32>, vector<128x128xf32>, vector<16x128xf32> -> vector<16x128xf32>
    %c0_31 = arith.constant 0 : index
    %c0_32 = arith.constant 0 : index
    %55 = vector.load %arg10[%c0_31, %c0_32] : memref<128x128xf32, #tpu.memory_space<vmem>>, vector<128x128xf32>
    %cst_33 = arith.constant dense<0.000000e+00> : vector<16x128xf32>
    %56 = tpu.matmul %52, %55, %cst_33 {dimension_numbers = #tpu.dot_dimension_numbers<[1], [0], [0], [1], [0, 0, 1, 1], [], []>} : vector<16x128xf32>, vector<128x128xf32>, vector<16x128xf32> -> vector<16x128xf32>
    %57 = arith.addf %54, %56 : vector<16x128xf32>
    %58 = arith.mulf %51, %52 : vector<16x128xf32>
    %c0_34 = arith.constant 0 : index
    %c0_35 = arith.constant 0 : index
    %59 = vector.load %arg11[%c0_34, %c0_35] : memref<128x128xf32, #tpu.memory_space<vmem>>, vector<128x128xf32>
    %cst_36 = arith.constant dense<0.000000e+00> : vector<16x128xf32>
    %60 = tpu.matmul %58, %59, %cst_36 {dimension_numbers = #tpu.dot_dimension_numbers<[1], [0], [0], [1], [0, 0, 1, 1], [], []>} : vector<16x128xf32>, vector<128x128xf32>, vector<16x128xf32> -> vector<16x128xf32>
    %61 = arith.addf %57, %60 : vector<16x128xf32>
    %c0_37 = arith.constant 0 : index
    %c0_38 = arith.constant 0 : index
    %62 = vector.load %arg12[%c0_37, %c0_38] : memref<1x128xf32, #tpu.memory_space<vmem>>, vector<1x128xf32>
    %63 = vector.broadcast %62 : vector<1x128xf32> to vector<16x128xf32>
    %64 = arith.addf %61, %63 : vector<16x128xf32>
    %cst_39 = arith.constant 0.000000e+00 : f32
    %65 = vector.broadcast %cst_39 : f32 to vector<16x128xf32>
    %66 = arith.maximumf %64, %65 : vector<16x128xf32>
    %67 = vector.shape_cast %66 : vector<16x128xf32> to vector<2x8x128xf32>
    %c0_40 = arith.constant 0 : index
    %c0_41 = arith.constant 0 : index
    %c0_42 = arith.constant 0 : index
    %68 = vector.load %arg13[%c0_40, %c0_41, %c0_42] : memref<2x8x128xf32, #tpu.memory_space<vmem>>, vector<2x8x128xf32>
    tpu.vector_store %arg13[%c0_40, %c0_41, %c0_42], %67 {strides = array<i32>} : memref<2x8x128xf32, #tpu.memory_space<vmem>>, vector<2x8x128xf32>,
    return
  }
  func.func @transform_0(%arg0: i32) -> (i32, i32, i32) {
    %c0_i32 = arith.constant 0 : i32
    %c0_i32_0 = arith.constant 0 : i32
    %c0_i32_1 = arith.constant 0 : i32
    return %arg0, %c0_i32, %c0_i32_0 : i32, i32, i32
  }
  func.func @transform_1(%arg0: i32) -> (i32, i32, i32) {
    %c0_i32 = arith.constant 0 : i32
    %c0_i32_0 = arith.constant 0 : i32
    %c0_i32_1 = arith.constant 0 : i32
    return %arg0, %c0_i32, %c0_i32_0 : i32, i32, i32
  }
  func.func @transform_2(%arg0: i32) -> (i32, i32, i32) {
    %c0_i32 = arith.constant 0 : i32
    %c0_i32_0 = arith.constant 0 : i32
    %c0_i32_1 = arith.constant 0 : i32
    return %arg0, %c0_i32, %c0_i32_0 : i32, i32, i32
  }
  func.func @transform_3(%arg0: i32) -> (i32, i32, i32) {
    %c0_i32 = arith.constant 0 : i32
    %c0_i32_0 = arith.constant 0 : i32
    %c0_i32_1 = arith.constant 0 : i32
    return %arg0, %c0_i32, %c0_i32_0 : i32, i32, i32
  }
  func.func @transform_4(%arg0: i32) -> (i32, i32) {
    %c0_i32 = arith.constant 0 : i32
    %c0_i32_0 = arith.constant 0 : i32
    %c0_i32_1 = arith.constant 0 : i32
    return %c0_i32, %c0_i32_0 : i32, i32
  }
  func.func @transform_5(%arg0: i32) -> (i32, i32) {
    %c0_i32 = arith.constant 0 : i32
    %c0_i32_0 = arith.constant 0 : i32
    %c0_i32_1 = arith.constant 0 : i32
    return %c0_i32, %c0_i32_0 : i32, i32
  }
  func.func @transform_6(%arg0: i32) -> (i32, i32) {
    %c0_i32 = arith.constant 0 : i32
    %c0_i32_0 = arith.constant 0 : i32
    %c0_i32_1 = arith.constant 0 : i32
    return %c0_i32, %c0_i32_0 : i32, i32
  }
  func.func @transform_7(%arg0: i32) -> (i32, i32) {
    %c0_i32 = arith.constant 0 : i32
    %c0_i32_0 = arith.constant 0 : i32
    %c0_i32_1 = arith.constant 0 : i32
    return %c0_i32, %c0_i32_0 : i32, i32
  }
  func.func @transform_8(%arg0: i32) -> (i32, i32) {
    %c0_i32 = arith.constant 0 : i32
    %c0_i32_0 = arith.constant 0 : i32
    %c0_i32_1 = arith.constant 0 : i32
    return %c0_i32, %c0_i32_0 : i32, i32
  }
  func.func @transform_9(%arg0: i32) -> (i32, i32) {
    %c0_i32 = arith.constant 0 : i32
    %c0_i32_0 = arith.constant 0 : i32
    %c0_i32_1 = arith.constant 0 : i32
    return %c0_i32, %c0_i32_0 : i32, i32
  }
  func.func @transform_10(%arg0: i32) -> (i32, i32) {
    %c0_i32 = arith.constant 0 : i32
    %c0_i32_0 = arith.constant 0 : i32
    %c0_i32_1 = arith.constant 0 : i32
    return %c0_i32, %c0_i32_0 : i32, i32
  }
  func.func @transform_11(%arg0: i32) -> (i32, i32) {
    %c0_i32 = arith.constant 0 : i32
    %c0_i32_0 = arith.constant 0 : i32
    %c0_i32_1 = arith.constant 0 : i32
    return %c0_i32, %c0_i32_0 : i32, i32
  }
  func.func @transform_12(%arg0: i32) -> (i32, i32, i32) {
    %c0_i32 = arith.constant 0 : i32
    %c0_i32_0 = arith.constant 0 : i32
    %c0_i32_1 = arith.constant 0 : i32
    return %arg0, %c0_i32, %c0_i32_0 : i32, i32, i32
  }
}

</mosaic_0001>

<bundles_post_ra>
// kernel: tpu_custom_call.1
= control target key start
LH: loop header
LB: loop body
LE: loop exit
PB: predicated region body
PF: predicated region fallthrough
CT: control target
= control target key end

     0   :  { %s900_s0 = inlined_call_operand.vmem [shape: f32[2,8,128], index: 0, kind: input, shape index: {}]   ;;  %s901_s1 = inlined_call_operand.vmem [shape: f32[2,8,1], index: 1, kind: input, shape index: {}]   ;;  %s902_s2 = inlined_call_operand.hbm [shape: f32[2,8,128], index: 2, kind: input, shape index: {}]   ;;  %s903_s3 = inlined_call_operand.vmem [shape: f32[2,1,8], index: 3, kind: input, shape index: {}]   ;;  %s904_s4 = inlined_call_operand.vmem [shape: f32[1,128], index: 4, kind: input, shape index: {}]   ;;  %s905_s5 = inlined_call_operand.vmem [shape: f32[1,128], index: 5, kind: input, shape index: {}]   ;;  %s906_s6 = inlined_call_operand.<no memory space> [shape: f32[1,1], index: 6, kind: input, shape index: {}]   ;;  %s907_s7 = inlined_call_operand.vmem [shape: f32[1,128], index: 7, kind: input, shape index: {}]   ;;  %s908_s8 = inlined_call_operand.hbm [shape: f32[128,128], index: 8, kind: input, shape index: {}]   ;;  %s909_s9 = inlined_call_operand.hbm [shape: f32[128,128], index: 9, kind: input, shape index: {}]   ;;  %s910_s10 = inlined_call_operand.hbm [shape: f32[128,128], index: 10, kind: input, shape index: {}]   ;;  %s911_s11 = inlined_call_operand.vmem [shape: f32[1,128], index: 11, kind: input, shape index: {}]   ;;  %s912_s12 = inlined_call_operand.hbm [shape: f32[2,8,128], index: 12, kind: output, shape index: {}]  }
   0x1   :  { %v17_v0 = vstv %s906_s6 }
   0x2   :  { %18 = vst [vmem:[#allocation2] sm:$0x1] %v17_v0 }
   0x3   :  { %19 = vsyncpa [#allocation4], 0 }
   0x4   :  { %20 = vsyncpa [#allocation7], 0 }
   0x5   :  { %21 = vsyncpa [#allocation10], 0 }
   0x6   :  { %22 = vsyncpa [#allocation5], 0  ;;  %s54_s25 = sshll.u32 %s908_s8, 4  ;;  %s743_s26 = smov [#allocation6]   ;;  %s55_s25 = int_to_ptr.hbm [resolvable:$true] %s54_s25 }
   0x7   :  { %s56_s27 = sshll.u32 %s743_s26, 4  ;;  %s31_s30 = sshll.u32 %s902_s2, 4  ;;  %s57_s27 = int_to_ptr.vmem [resolvable:$true] %s56_s27  ;;  %s32_s30 = int_to_ptr.hbm [resolvable:$true] %s31_s30 }
   0x8   :  { %s744_s13 = smov 128   ;;  %s745_s14 = smov 8  }
   0x9   :  { %62 = dma.hbm_to_vmem [thread:$0]  %s55_s25, 2048, %s57_s27, [#allocation7], %s744_s13, %s744_s13, %s745_s14  }
   0xa   :  { %s746_s6 = smov [#allocation3]   ;;  %s67_s8 = sshll.u32 %s909_s9, 4  ;;  %s68_s8 = int_to_ptr.hbm [resolvable:$true] %s67_s8 }
   0xb   :  { %s33_s15 = sshll.u32 %s746_s6, 4  ;;  %s80_s19 = sshll.u32 %s910_s10, 4  ;;  %s34_s15 = int_to_ptr.vmem [resolvable:$true] %s33_s15  ;;  %s81_s19 = int_to_ptr.hbm [resolvable:$true] %s80_s19 }
   0xc   :  { %39 = dma.hbm_to_vmem [thread:$0]  %s32_s30, 256, %s34_s15, [#allocation4], %s744_s13, %s744_s13, %s745_s14  }
   0xd   :  { %s747_s20 = smov [#allocation8]   ;;  %s748_s22 = smov [#allocation9]  }
   0xe   :  { %s69_s21 = sshll.u32 %s747_s20, 4  ;;  %s82_s9 = sshll.u32 %s748_s22, 4  ;;  %s70_s21 = int_to_ptr.vmem [resolvable:$true] %s69_s21  ;;  %s83_s9 = int_to_ptr.vmem [resolvable:$true] %s82_s9 }
   0xf   :  { %75 = dma.hbm_to_vmem [thread:$0]  %s68_s8, 2048, %s70_s21, [#allocation7], %s744_s13, %s744_s13, %s745_s14  }
  0x10   :  { %88 = dma.hbm_to_vmem [thread:$0]  %s81_s19, 2048, %s83_s9, [#allocation10], %s744_s13, %s744_s13, %s745_s14  }
  0x11   :  { %735 = dma.done.wait [#allocation4], 256  }
  0x12   :  { %736 = vsyncadd [#allocation4], 4294967040 }
  0x13   :  { %737 = dma.done.wait [#allocation7], 4096  }
  0x14   :  { %738 = vsyncadd [#allocation7], 4294963200 }
  0x15   :  { %739 = dma.done.wait [#allocation10], 2048  }
  0x16   :  { %740 = vsyncadd [#allocation10], 4294965248  ;;  %v107_v1 = vld [vmem:[%s900_s0] sm:$0xff]  ;;  %v851_v5 = vld [vmem:[#allocation3 + $0x8] sm:$0xff]  ;;  %v749_v12 = vmov 0   ;;  %vm262_vm0 = vcmask 64512  }
  0x17   :  { %v603_v2 = vld [vmem:[%s904_s4] ss:$0 sm:$0xff]  ;;  %377 = vmatpush.msra.mxu0 %v107_v1  ;;  %v849_v4 = vld [vmem:[#allocation3] sm:$0xff]  ;;  %600 = vset.pattern.permute.xlu1 %v749_v12  ;;  %s750_s2 = smov [#allocation11]   ;;  %s574_s21 = sshll.u32 %s912_s12, 4  ;;  %s575_s21 = int_to_ptr.hbm [resolvable:$true] %s574_s21 }
  0x18   :  { %v119_v3 = vmul.f32 %v603_v2, %v107_v1  ;;  %147 = vmatpush.xpose.msra.mxu1 %v849_v4  ;;  %v131_v6 = vld [vmem:[%s905_s5] sm:$0x1]  ;;  %v108_v7 = vld [vmem:[%s900_s0 + $0x8] sm:$0xff]  ;;  %601 = vset.pattern.permute.xlu2 %v749_v12  ;;  %v114_v27 = vld [vmem:[%s903_s3 + $0x1] sm:$0x1]  ;;  %s572_s18 = sshll.u32 %s750_s2, 4  ;;  %s573_s18 = int_to_ptr.vmem [resolvable:$true] %s572_s18 }
  0x19   :  { %v120_v8 = vmul.f32 %v603_v2, %v108_v7  ;;  %v604_v9 = vld [vmem:[%s907_s7] ss:$0 sm:$0xff]  ;;  %v112_v20 = vld [vmem:[%s901_s1 + $0x8] sm:$0xff]  ;;  %v223_v29 = vsub.f32 1.0, %v114_v27 }
  0x1a   :  { %121 = vadd.xlane.f32.xlu0 %v119_v3  ;;  %v176_v10 = vmul.f32 %v604_v9, %v107_v1  ;;  %v177_v11 = vmul.f32 %v604_v9, %v108_v7  ;;  %v605_v13 = vld [vmem:[#allocation2] ss:$0 sm:$0xff]  ;;  %v219_v22 = vsub.f32 1.0, %v112_v20 }
  0x1b   :  { %148 = vmatmul.f32.vlgmr.msra.gmra.mxu1 %v131_v6  ;;  %v111_v15 = vld [vmem:[%s901_s1] sm:$0xff]  ;;  %v225_v33 = vmul.f32 -10000.0, %v223_v29 }
  0x1c   :  { %167 = vmatpush.xpose.msrb.mxu1 %v851_v5  ;;  %v218_v17 = vsub.f32 1.0, %v111_v15  ;;  %v221_v23 = vmul.f32 -10000.0, %v219_v22  ;;  %v113_v39 = vld [vmem:[%s903_s3] sm:$0x1] }
  0x1d   :  { %v257_v35 = vperm.slane %v225_v33, 0  ;;  %v222_v42 = vsub.f32 1.0, %v113_v39 }
  0x1e   :  { %v220_v18 = vmul.f32 -10000.0, %v218_v17 }
  0x1f   :  { %v224_v48 = vmul.f32 -10000.0, %v222_v42 }
  0x20   :  { %193 = vmatpush.xpose.msra.mxu1 %v849_v4 }
  0x21   :  { %v256_v52 = vperm.slane %v224_v48, 0  ;;  %v451_v48 = vld [vmem:[#allocation6 + $0x70] sm:$0xff] }
  0x22   :  { %123 = vadd.xlane.f32.xlu0 %v120_v8 }
  0x23   :  { %168 = vmatmul.f32.vlgmr.msrb.gmra.mxu1 %v131_v6 }
  0x24   :  { %213 = vmatpush.xpose.msrb.mxu1 %v851_v5 }
  0x2b   :  { %194 = vmatmul.f32.vlgmr.msra.gmra.mxu1 %v176_v10 }
  0x2c   :  { %432 = vmatpush.msra.mxu1 %v108_v7 }
  0x33   :  { %214 = vmatmul.f32.vlgmr.msrb.gmra.mxu1 %v177_v11 }
  0x8d   :  { %v122_v14 = vpop.xlane.xlu0 %121 }
  0x8e   :  { %v129_v16 = vadd.f32 %v605_v13, %v122_v14 }
  0x90   :  { %228 = vperm.xlu1 %600, %v129_v16  }
  0x95   :  { %v124_v19 = vpop.xlane.xlu0 %123 }
  0x96   :  { %v130_v21 = vadd.f32 %v605_v13, %v124_v19 }
  0x98   :  { %244 = vperm.xlu1 %600, %v220_v18   ;;  %233 = vperm.xlu2 %601, %v130_v21   ;;  %v149_v24 = vpop.f32.mrf.mxu1 }
  0x99   :  { %v236_v45 = vperm.slane %v149_v24, 0 }
  0xa0   :  { %249 = vperm.xlu2 %601, %v221_v23   ;;  %v169_v25 = vpop.f32.mrf.mxu1 }
  0xa1   :  { %v237_v28 = vperm.slane %v169_v25, 0 }
  0xa8   :  { %v195_v26 = vpop.f32.mrf.mxu1 }
  0xb0   :  { %v215_v32 = vpop.f32.mrf.mxu1 }
  0xf2   :  { %v234_v30 = vpop.permute.xlu2 %233 }
  0xf3   :  { %v239_v31 = vadd.f32 %v237_v28, %v234_v30 }
  0xf5   :  { %v241_v34 = vadd.f32 %v239_v31, %v215_v32 }
  0xfa   :  { %v250_v36 = vpop.permute.xlu2 %249 }
  0xfb   :  { %v253_v37 = vadd.f32 %v250_v36, %v241_v34 }
  0xfd   :  { %v261_v38 = vadd.f32 %v257_v35, %v253_v37 }
  0xff   :  { %v270_v40 = vsel %vm262_vm0, %v261_v38, -inf }
 0x100   :  { %v271_v41 = vrot.slane %v270_v40, 4 }
 0x102   :  { %v272_v43 = vmax.f32 %v270_v40, %v271_v41  ;;  %v229_v44 = vpop.permute.xlu1 %228 }
 0x103   :  { %v238_v47 = vadd.f32 %v236_v45, %v229_v44  ;;  %v468_v45 = vld [vmem:[#allocation8 + $0x78] sm:$0xff] }
 0x104   :  { %v273_v46 = vrot.slane %v272_v43, 2  ;;  %469 = vmatpush.msra.mxu2 %v468_v45 }
 0x105   :  { %v240_v51 = vadd.f32 %v238_v47, %v195_v26  ;;  %v467_v47 = vld [vmem:[#allocation8 + $0x70] sm:$0xff] }
 0x106   :  { %v274_v49 = vmax.f32 %v272_v43, %v273_v46  ;;  %v452_v46 = vld [vmem:[#allocation6 + $0x78] sm:$0xff]  ;;  %470 = vmatpush.msra.mxu2 %v467_v47 }
 0x107   :  { %492 = vmatpush.msra.mxu3 %v452_v46 }
 0x108   :  { %v275_v50 = vrot.slane %v274_v49, 1 }
 0x109   :  { %493 = vmatpush.msra.mxu3 %v451_v48 }
 0x10a   :  { %v276_v53 = vmax.f32 %v274_v49, %v275_v50  ;;  %v245_v54 = vpop.permute.xlu1 %244  ;;  %v532_v49 = vld [vmem:[#allocation9 + $0x78] sm:$0xff]  ;;  %v466_v50 = vld [vmem:[#allocation8 + $0x68] sm:$0xff] }
 0x10b   :  { %v252_v55 = vadd.f32 %v245_v54, %v240_v51  ;;  %533 = vmatpush.msrb.mxu0 %v532_v49  ;;  %v450_v51 = vld [vmem:[#allocation6 + $0x68] sm:$0xff]  ;;  %v465_v54 = vld [vmem:[#allocation8 + $0x60] sm:$0xff]  ;;  %471 = vmatpush.msra.mxu2 %v466_v50 }
 0x10c   :  { %v278_v56 = vsub.f32 %v261_v38, %v276_v53  ;;  %v530_v53 = vld [vmem:[#allocation9 + $0x68] sm:$0xff]  ;;  %494 = vmatpush.msra.mxu3 %v450_v51 }
 0x10d   :  { %v260_v57 = vadd.f32 %v256_v52, %v252_v55  ;;  %v531_v52 = vld [vmem:[#allocation9 + $0x70] sm:$0xff]  ;;  %v449_v55 = vld [vmem:[#allocation6 + $0x60] sm:$0xff]  ;;  %472 = vmatpush.msra.mxu2 %v465_v54 }
 0x10e   :  { %v281_v58 = vmul.f32 1.442695, %v278_v56  ;;  %534 = vmatpush.msrb.mxu0 %v531_v52  ;;  %v464_v56 = vld [vmem:[#allocation8 + $0x58] sm:$0xff]  ;;  %495 = vmatpush.msra.mxu3 %v449_v55 }
 0x10f   :  { %v263_v59 = vsel %vm262_vm0, %v260_v57, -inf  ;;  %473 = vmatpush.msra.mxu2 %v464_v56 }
 0x110   :  { %607 = vpow2.f32 %v281_v58  ;;  %v264_v60 = vrot.slane %v263_v59, 4  ;;  %535 = vmatpush.msrb.mxu0 %v530_v53  ;;  %v528_v58 = vld [vmem:[#allocation9 + $0x58] sm:$0xff] }
 0x112   :  { %v265_v61 = vmax.f32 %v263_v59, %v264_v60  ;;  %v463_v59 = vld [vmem:[#allocation8 + $0x50] sm:$0xff] }
 0x113   :  { %v447_v60 = vld [vmem:[#allocation6 + $0x50] sm:$0xff]  ;;  %474 = vmatpush.msra.mxu2 %v463_v59 }
 0x114   :  { %v266_v62 = vrot.slane %v265_v61, 2 }
 0x116   :  { %v608_v63 = vpop.eup %607  ;;  %v267_v0 = vmax.f32 %v265_v61, %v266_v62  ;;  %v527_v61 = vld [vmem:[#allocation9 + $0x50] sm:$0xff]  ;;  %v462_v62 = vld [vmem:[#allocation8 + $0x48] sm:$0xff] }
 0x117   :  { %v290_v1 = vsel %vm262_vm0, %v608_v63, 0.0  ;;  %475 = vmatpush.msra.mxu2 %v462_v62 }
 0x118   :  { %v291_v2 = vrot.slane %v290_v1, 4  ;;  %v268_v3 = vrot.slane %v267_v0, 1 }
 0x11a   :  { %v292_v6 = vadd.f32 %v291_v2, %v290_v1  ;;  %v269_v7 = vmax.f32 %v267_v0, %v268_v3  ;;  %v526_v0 = vld [vmem:[#allocation9 + $0x48] sm:$0xff]  ;;  %v461_v1 = vld [vmem:[#allocation8 + $0x40] sm:$0xff] }
 0x11b   :  { %v445_v2 = vld [vmem:[#allocation6 + $0x40] sm:$0xff]  ;;  %476 = vmatpush.msra.mxu2 %v461_v1 }
 0x11c   :  { %v293_v8 = vrot.slane %v292_v6, 2  ;;  %v277_v9 = vsub.f32 %v260_v57, %v269_v7  ;;  %v448_v57 = vld [vmem:[#allocation6 + $0x58] sm:$0xff]  ;;  %v525_v3 = vld [vmem:[#allocation9 + $0x40] sm:$0xff] }
 0x11d   :  { %496 = vmatpush.msra.mxu3 %v448_v57  ;;  %v444_v7 = vld [vmem:[#allocation6 + $0x38] sm:$0xff] }
 0x11e   :  { %v294_v10 = vadd.f32 %v293_v8, %v292_v6  ;;  %v279_v11 = vmul.f32 1.442695, %v277_v9  ;;  %v460_v6 = vld [vmem:[#allocation8 + $0x38] sm:$0xff] }
 0x11f   :  { %497 = vmatpush.msra.mxu3 %v447_v60  ;;  %v524_v9 = vld [vmem:[#allocation9 + $0x38] sm:$0xff]  ;;  %477 = vmatpush.msra.mxu2 %v460_v6 }
 0x120   :  { %v295_v13 = vrot.slane %v294_v10, 1  ;;  %609 = vpow2.f32 %v279_v11  ;;  %v443_v11 = vld [vmem:[#allocation6 + $0x30] sm:$0xff] }
 0x122   :  { %v296_v14 = vadd.f32 %v295_v13, %v294_v10  ;;  %v459_v10 = vld [vmem:[#allocation8 + $0x30] sm:$0xff] }
 0x123   :  { %v523_v13 = vld [vmem:[#allocation9 + $0x30] sm:$0xff]  ;;  %478 = vmatpush.msra.mxu2 %v459_v10 }
 0x124   :  { %611 = vrcp.f32 %v296_v14  ;;  %v322_v24 = vand.u32 2147483648, %v296_v14  ;;  %v320_v26 = vand.u32 2147483647, %v296_v14  ;;  %vm316_vm2 = vweird.f32 %v296_v14 }
 0x126   :  { %v610_v15 = vpop.eup %609  ;;  %v323_v30 = vor.u32 1.1754944e-38, %v322_v24  ;;  %vm321_vm4 = vcmp.eq.f32.partialorder %v320_v26, 8.507059e+37  ;;  %v439_v24 = vld [vmem:[#allocation6 + $0x10] sm:$0xff]  ;;  %v454_v26 = vld [vmem:[#allocation8 + $0x8] sm:$0xff] }
 0x127   :  { %v283_v16 = vsel %vm262_vm0, %v610_v15, 0.0 }
 0x128   :  { %v284_v17 = vrot.slane %v283_v16, 4 }
 0x12a   :  { %v612_v18 = vpop.eup %611  ;;  %v285_v19 = vadd.f32 %v284_v17, %v283_v16  ;;  %v522_v16 = vld [vmem:[#allocation9 + $0x28] sm:$0xff]  ;;  %v457_v17 = vld [vmem:[#allocation8 + $0x20] sm:$0xff] }
 0x12b   :  { %v312_v20 = vmul.f32 %v612_v18, %v296_v14  ;;  %vm317_vm1 = vweird.f32 %v612_v18  ;;  %v458_v14 = vld [vmem:[#allocation8 + $0x28] sm:$0xff] }
 0x12c   :  { %v286_v21 = vrot.slane %v285_v19, 2  ;;  %vm318_vm3 = vmor %vm316_vm2, %vm317_vm1  ;;  %479 = vmatpush.msra.mxu2 %v458_v14 }
 0x12d   :  { %v313_v22 = vsub.f32 1.0, %v312_v20  ;;  %v456_v20 = vld [vmem:[#allocation8 + $0x18] sm:$0xff] }
 0x12e   :  { %v287_v23 = vadd.f32 %v286_v21, %v285_v19  ;;  %v521_v19 = vld [vmem:[#allocation9 + $0x20] sm:$0xff]  ;;  %v440_v21 = vld [vmem:[#allocation6 + $0x18] sm:$0xff]  ;;  %480 = vmatpush.msra.mxu2 %v457_v17 }
 0x12f   :  { %v314_v25 = vmul.f32 %v612_v18, %v313_v22  ;;  %v520_v22 = vld [vmem:[#allocation9 + $0x18] sm:$0xff] }
 0x130   :  { %v288_v27 = vrot.slane %v287_v23, 1  ;;  %481 = vmatpush.msra.mxu2 %v456_v20 }
 0x131   :  { %v315_v28 = vadd.f32 %v612_v18, %v314_v25  ;;  %v519_v25 = vld [vmem:[#allocation9 + $0x10] sm:$0xff] }
 0x132   :  { %v289_v29 = vadd.f32 %v288_v27, %v287_v23  ;;  %v455_v23 = vld [vmem:[#allocation8 + $0x10] sm:$0xff]  ;;  %v438_v27 = vld [vmem:[#allocation6 + $0x8] sm:$0xff] }
 0x133   :  { %v319_v31 = vsel %vm318_vm3, %v612_v18, %v315_v28  ;;  %v441_v18 = vld [vmem:[#allocation6 + $0x20] sm:$0xff]  ;;  %482 = vmatpush.msra.mxu2 %v455_v23 }
 0x134   :  { %613 = vrcp.f32 %v289_v29  ;;  %v324_v32 = vsel %vm321_vm4, %v323_v30, %v319_v31  ;;  %v308_v37 = vand.u32 2147483648, %v289_v29  ;;  %v306_v39 = vand.u32 2147483647, %v289_v29  ;;  %v437_v30 = vld [vmem:[#allocation6] sm:$0xff]  ;;  %v518_v31 = vld [vmem:[#allocation9 + $0x8] sm:$0xff] }
 0x135   :  { %v326_v33 = vmul.f32 %v608_v63, %v324_v32  ;;  %vm302_vm6 = vweird.f32 %v289_v29  ;;  %v446_v63 = vld [vmem:[#allocation6 + $0x48] sm:$0xff]  ;;  %483 = vmatpush.msra.mxu2 %v454_v26  ;;  %v517_v32 = vld [vmem:[#allocation9] sm:$0xff] }
 0x136   :  { %v309_v41 = vor.u32 1.1754944e-38, %v308_v37  ;;  %vm307_vm8 = vcmp.eq.f32.partialorder %v306_v39, 8.507059e+37  ;;  %498 = vmatpush.msra.mxu3 %v446_v63 }
 0x137   :  { %382 = vxpose.xlu1.b32.start.end [1/1] (short) (narrow) %v326_v33, 8 }
 0x138   :  { %499 = vmatpush.msra.mxu3 %v445_v2 }
 0x13a   :  { %v614_v34 = vpop.eup %613  ;;  %500 = vmatpush.msra.mxu3 %v444_v7 }
 0x13b   :  { %v298_v35 = vmul.f32 %v614_v34, %v289_v29  ;;  %vm303_vm5 = vweird.f32 %v614_v34  ;;  %v453_v29 = vld [vmem:[#allocation8] sm:$0xff] }
 0x13c   :  { %vm304_vm7 = vmor %vm302_vm6, %vm303_vm5  ;;  %501 = vmatpush.msra.mxu3 %v443_v11  ;;  %484 = vmatpush.msra.mxu2 %v453_v29 }
 0x13d   :  { %v299_v36 = vsub.f32 1.0, %v298_v35 }
 0x13f   :  { %v300_v38 = vmul.f32 %v614_v34, %v299_v36 }
 0x141   :  { %v301_v40 = vadd.f32 %v614_v34, %v300_v38 }
 0x143   :  { %v305_v42 = vsel %vm304_vm7, %v614_v34, %v301_v40 }
 0x144   :  { %v310_v43 = vsel %vm307_vm8, %v309_v41, %v305_v42  ;;  %v606_v41 = vld [vmem:[%s911_s11] ss:$0 sm:$0xff] }
 0x145   :  { %v325_v44 = vmul.f32 %v610_v15, %v310_v43  ;;  %v442_v15 = vld [vmem:[#allocation6 + $0x28] sm:$0xff] }
 0x146   :  { %502 = vmatpush.msra.mxu3 %v442_v15 }
 0x147   :  { %327 = vxpose.xlu0.b32.start.end [1/1] (short) (narrow) %v325_v44, 8 }
 0x148   :  { %503 = vmatpush.msra.mxu3 %v441_v18 }
 0x14a   :  { %504 = vmatpush.msra.mxu3 %v440_v21 }
 0x14c   :  { %505 = vmatpush.msra.mxu3 %v439_v24 }
 0x14e   :  { %506 = vmatpush.msra.mxu3 %v438_v27 }
 0x150   :  { %507 = vmatpush.msra.mxu3 %v437_v30 }
 0x151   :  { %508 = vmatmul.f32.vlgmr.msra.gmra.mxu3 %v849_v4 }
 0x159   :  { %511 = vmatmul.f32.gmra.mxu3 %v851_v5 }
 0x1ae   :  { %602 = vset.pattern.permute.xlu0 %v749_v12  ;;  %v529_v12 = vld [vmem:[#allocation9 + $0x60] sm:$0xff] }
 0x1af   :  { %536 = vmatpush.msrb.mxu0 %v529_v12 }
 0x1b1   :  { %537 = vmatpush.msrb.mxu0 %v528_v58 }
 0x1b3   :  { %538 = vmatpush.msrb.mxu0 %v527_v61 }
 0x1b5   :  { %539 = vmatpush.msrb.mxu0 %v526_v0 }
 0x1b7   :  { %540 = vmatpush.msrb.mxu0 %v525_v3 }
 0x1b9   :  { %541 = vmatpush.msrb.mxu0 %v524_v9 }
 0x1bb   :  { %542 = vmatpush.msrb.mxu0 %v523_v13 }
 0x1bd   :  { %543 = vmatpush.msrb.mxu0 %v522_v16 }
 0x1bf   :  { %544 = vmatpush.msrb.mxu0 %v521_v19 }
 0x1c1   :  { %545 = vmatpush.msrb.mxu0 %v520_v22 }
 0x1c3   :  { %546 = vmatpush.msrb.mxu0 %v519_v25 }
 0x1c5   :  { %547 = vmatpush.msrb.mxu0 %v518_v31 }
 0x1c7   :  { %548 = vmatpush.msrb.mxu0 %v517_v32 }
 0x1d4   :  { %v509_v37 = vpop.f32.mrf.mxu3 }
 0x1db   :  { %v398_v8 = vpop.trf.xlu1 }
 0x1dc   :  { %590 = vmatmul.msk.f32.vlgmr.msra.gmra.mxu1 %vm262_vm0, %v398_v8  ;;  %v512_v44 = vpop.f32.mrf.mxu3 }
 0x1eb   :  { %v343_v28 = vpop.trf.xlu0 }
 0x1ec   :  { %589 = vmatmul.msk.f32.vlgmr.msra.gmra.mxu0 %vm262_vm0, %v343_v28 }
 0x259   :  { %v434_v35 = vpop.f32.mrf.mxu1 }
 0x25a   :  { %v516_v36 = vmul.f32 %v434_v35, %v851_v5 }
 0x269   :  { %v379_v33 = vpop.f32.mrf.mxu0 }
 0x26a   :  { %v515_v34 = vmul.f32 %v379_v33, %v849_v4  ;;  %485 = vmatmul.f32.vlgmr.msra.gmra.mxu2 %v379_v33 }
 0x26c   :  { %549 = vmatmul.f32.vlgmr.msrb.gmra.mxu0 %v515_v34 }
 0x272   :  { %488 = vmatmul.f32.gmra.mxu2 %v434_v35 }
 0x274   :  { %552 = vmatmul.f32.gmra.mxu0 %v516_v36 }
 0x2e9   :  { %v550_v38 = vpop.f32.mrf.mxu0 }
 0x2ed   :  { %v486_v39 = vpop.f32.mrf.mxu2 }
 0x2ee   :  { %v510_v40 = vadd.f32 %v509_v37, %v486_v39 }
 0x2f0   :  { %v556_v42 = vadd.f32 %v550_v38, %v510_v40 }
 0x2f1   :  { %v553_v47 = vpop.f32.mrf.mxu0 }
 0x2f2   :  { %v562_v43 = vadd.f32 %v606_v41, %v556_v42 }
 0x2f4   :  { %v564_v45 = vmax.f32 %v562_v43, 0.0 }
 0x2f5   :  { %v489_v4 = vpop.f32.mrf.mxu2 }
 0x2f6   :  { %566 = vst [vmem:[#allocation11] sm:$0xff] %v564_v45  ;;  %v513_v46 = vadd.f32 %v512_v44, %v489_v4 }
 0x2f8   :  { %v557_v48 = vadd.f32 %v553_v47, %v513_v46 }
 0x2fa   :  { %v563_v5 = vadd.f32 %v606_v41, %v557_v48 }
 0x2fc   :  { %v565_v49 = vmax.f32 %v563_v5, 0.0 }
 0x2fe   :  { %567 = vst [vmem:[#allocation11 + $0x8] sm:$0xff] %v565_v49 }
 0x2ff   :  { %580 = dma.vmem_to_hbm [thread:$0]  %s573_s18, 256, %s575_s21, [#allocation5], %s744_s13, %s744_s13, %s745_s14  }
 0x300   :  { %741 = dma.done.wait [#allocation5], 256  }
 0x301   :  { %742 = vsyncadd [#allocation5], 4294967040 }
 0x302   :  { %585 = vsyncpa [#allocation4], 1 }
 0x303   :  { %586 = vsyncpa [#allocation7], 1 }
 0x304   :  { %587 = vsyncpa [#allocation10], 1 }
 0x305   :  { %588 = vsyncpa [#allocation5], 1 }

</bundles_post_ra>
